<compile_context>
chip_gen: v7x
topology: tpu7x:2x2x1
jax: 0.10.0
libtpu: 0.0.40
codegen_flags: <defaults>
</compile_context>

<pallas_src>
import jax
import jax.numpy as jnp
from jax import lax
from jax.experimental import pallas as pl
from jax.experimental.pallas import tpu as pltpu

_LANE = 128
_TARGET_BLOCK_BYTES = 2 * 1024 * 1024  # per pipeline buffer per input


def _make_l1_partial_sum_kernel(steps, block_rows, rows_valid, sub, needs_mask):
    """Per-partition partial sum of |pred - target| into a resident
    (1, sub, 128) f32 accumulator (output block reused across the inner axis)."""

    def kernel(pred_ref, target_ref, out_ref):
        i = pl.program_id(1)

        @pl.when(i == 0)
        def _():
            out_ref[...] = jnp.zeros_like(out_ref)

        # sub/abs in the input dtype (bf16-capable VPU on v6e/v7x); only the
        # accumulation below widens to f32.
        diff = jnp.abs(pred_ref[...] - target_ref[...])

        if needs_mask:
            # Traced in only when the covered row space != rows_valid: zero out
            # rows past the true row count (boundary-block garbage and clamped
            # fully-out-of-range blocks of an uneven partition split).
            p = pl.program_id(0)
            row_start = (p * steps + i) * block_rows
            row_ids = row_start + lax.broadcasted_iota(
                jnp.int32, (block_rows, _LANE), 0)
            diff = jnp.where(row_ids < rows_valid, diff, jnp.zeros_like(diff))

        # (block_rows,128) -> (1, groups, sub, 128) -> vreg-wise VPU adds into
        # the (1, sub, 128) f32 accumulator.  Cross-lane reduce happens once in
        # the wrapper.
        out_ref[...] += jnp.sum(
            diff.reshape(1, -1, sub, _LANE), axis=1, dtype=jnp.float32)

    return kernel


def l1_loss(pred: jax.Array, target: jax.Array) -> jax.Array:
    """mean(|pred - target|), matching nn.L1Loss()(pred, target)."""
    assert pred.shape == target.shape, (pred.shape, target.shape)
    n = pred.size
    assert n > 0

    pred_f = pred.reshape(-1)
    target_f = target.reshape(-1)

    itemsize = jnp.dtype(pred.dtype).itemsize
    sub = max(8, 32 // itemsize)          # sublane group: 8 f32, 16 bf16, 32 int8
    rows_valid = n // _LANE
    n_main = rows_valid * _LANE
    tail = n - n_main

    # Ragged sub-128-element tail: plain jnp (negligible cost).
    if tail:
        tail_sum = jnp.sum(jnp.abs(pred_f[n_main:] - target_f[n_main:]),
                           dtype=jnp.float32)
    else:
        tail_sum = jnp.float32(0.0)

    if rows_valid < sub:
        # Tiny input (< sub*128 elements): a kernel launch is not worth it.
        total = jnp.sum(jnp.abs(pred_f - target_f), dtype=jnp.float32)
        return (total / jnp.float32(n)).astype(pred.dtype)

    # Zero-copy (rows, 128) views when n % 128 == 0.  For ragged sizes only the
    # aligned prefix is sliced (at most one copy of <= n elements, vs. the old
    # full jnp.pad which wrote more than n and made the kernel read the pad).
    if tail:
        pred2d = pred_f[:n_main].reshape(rows_valid, _LANE)
        target2d = target_f[:n_main].reshape(rows_valid, _LANE)
    else:
        pred2d = pred_f.reshape(rows_valid, _LANE)
        target2d = target_f.reshape(rows_valid, _LANE)

    # Block geometry: ~2 MiB per pipeline buffer; block_rows is a multiple of
    # the dtype's sublane group and never exceeds the array's row count.
    block_rows_target = max(sub, _TARGET_BLOCK_BYTES // (_LANE * itemsize))
    block_rows = min(block_rows_target, (rows_valid // sub) * sub)
    total_blocks = pl.cdiv(rows_valid, block_rows)

    # Leading "parallel" axis: both TensorCores on v7x; serial no-op elsewhere.
    num_parts = 2 if total_blocks >= 2 else 1
    steps = pl.cdiv(total_blocks, num_parts)
    needs_mask = (num_parts * steps * block_rows != rows_valid)

    # Clamp fully out-of-range block indices (uneven split) into bounds; their
    # rows are zeroed by the in-kernel mask, so the result stays exact.
    def in_map(p, i):
        return (jnp.minimum(p * steps + i, total_blocks - 1), 0)

    cost = pl.CostEstimate(
        flops=3 * n_main,
        transcendentals=0,
        bytes_accessed=2 * n_main * itemsize + num_parts * sub * _LANE * 4,
    )

    kernel = _make_l1_partial_sum_kernel(
        steps, block_rows, rows_valid, sub, needs_mask)

    partials = pl.pallas_call(
        kernel,
        out_shape=jax.ShapeDtypeStruct((num_parts, sub, _LANE), jnp.float32),
        grid_spec=pltpu.PrefetchScalarGridSpec(
            num_scalar_prefetch=0,
            grid=(num_parts, steps),
            in_specs=[
                pl.BlockSpec((block_rows, _LANE), in_map),
                pl.BlockSpec((block_rows, _LANE), in_map),
            ],
            # Same block index across the inner (reduction) axis -> resident
            # per-partition f32 accumulator; lane-dense 128-wide stores.
            out_specs=pl.BlockSpec((1, sub, _LANE), lambda p, i: (p, 0, 0)),
        ),
        compiler_params=pltpu.CompilerParams(
            dimension_semantics=("parallel", "arbitrary"),
        ),
        cost_estimate=cost,
    )(pred2d, target2d)

    # Final cross-lane/sublane reduce + mean over the TRUE element count.
    total = jnp.sum(partials, dtype=jnp.float32) + tail_sum
    return (total / jnp.float32(n)).astype(pred.dtype)


if __name__ == "__main__":
    key = jax.random.PRNGKey(0)
    k1, k2, k3, k4 = jax.random.split(key, 4)

    # Offsets predicted by the upstream model; small NCHW-like shapes.
    pred = jax.random.normal(k1, (2, 4, 16, 16), dtype=jnp.float32)
    target = jax.random.normal(k2, (2, 4, 16, 16), dtype=jnp.float32)

    loss = l1_loss(pred, target)
    jax.block_until_ready(loss)
    ref = jnp.mean(jnp.abs(pred - target))
    assert jnp.allclose(loss, ref, rtol=1e-5, atol=1e-6), (loss, ref)

    # Ragged / multi-block shape: exercises the in-kernel boundary mask, the
    # 2-partition parallel axis, and the plain-jnp tail path.
    p2 = jax.random.normal(k3, (3, 5, 17, 31), dtype=jnp.float32)
    t2 = jax.random.normal(k4, (3, 5, 17, 31), dtype=jnp.float32)
    loss2 = l1_loss(p2, t2)
    jax.block_until_ready(loss2)
    ref2 = jnp.mean(jnp.abs(p2 - t2))
    assert jnp.allclose(loss2, ref2, rtol=1e-5, atol=1e-6), (loss2, ref2)

    print("KERNEL_OK")
</pallas_src>

<mosaic_0001>
module attributes {stable_mosaic.version = 11 : i64} {
  func.func @kernel(%arg0: i32, %arg1: i32, %arg2: memref<16x128xf32, #tpu.memory_space<vmem>>, %arg3: memref<16x128xf32, #tpu.memory_space<vmem>>, %arg4: memref<1x8x128xf32, #tpu.memory_space<vmem>>) attributes {dimension_semantics = [#tpu.dimension_semantics<parallel>, #tpu.dimension_semantics<arbitrary>], iteration_bounds = array<i64: 1, 1>, scalar_prefetch = 0 : i64, scratch_operands = 0 : i64, tpu.core_type = #tpu.core_type<tc>, window_params = [{transform_indices = @transform_0, window_bounds = array<i64: 16, 128>}, {transform_indices = @transform_1, window_bounds = array<i64: 16, 128>}, {transform_indices = @transform_2, window_bounds = array<i64: 1, 8, 128>}]} {
    %c0_i32 = arith.constant 0 : i32
    %0 = arith.cmpi eq, %arg1, %c0_i32 : i32
    %1 = arith.extui %0 : i1 to i32
    %c0_i32_0 = arith.constant 0 : i32
    %2 = arith.cmpi ne, %1, %c0_i32_0 : i32
    scf.if %2 {
      %cst_10 = arith.constant 0.000000e+00 : f32
      %12 = vector.broadcast %cst_10 : f32 to vector<1x8x128xf32>
      %c0_11 = arith.constant 0 : index
      %c0_12 = arith.constant 0 : index
      %c0_13 = arith.constant 0 : index
      %13 = vector.load %arg4[%c0_11, %c0_12, %c0_13] : memref<1x8x128xf32, #tpu.memory_space<vmem>>, vector<1x8x128xf32>
      tpu.vector_store %arg4[%c0_11, %c0_12, %c0_13], %12 {strides = array<i32>} : memref<1x8x128xf32, #tpu.memory_space<vmem>>, vector<1x8x128xf32>,
    } else {
    }
    %c0 = arith.constant 0 : index
    %c0_1 = arith.constant 0 : index
    %3 = vector.load %arg2[%c0, %c0_1] : memref<16x128xf32, #tpu.memory_space<vmem>>, vector<16x128xf32>
    %c0_2 = arith.constant 0 : index
    %c0_3 = arith.constant 0 : index
    %4 = vector.load %arg3[%c0_2, %c0_3] : memref<16x128xf32, #tpu.memory_space<vmem>>, vector<16x128xf32>
    %5 = arith.subf %3, %4 : vector<16x128xf32>
    %6 = math.absf %5 : vector<16x128xf32>
    %c0_4 = arith.constant 0 : index
    %c0_5 = arith.constant 0 : index
    %c0_6 = arith.constant 0 : index
    %7 = vector.load %arg4[%c0_4, %c0_5, %c0_6] : memref<1x8x128xf32, #tpu.memory_space<vmem>>, vector<1x8x128xf32>
    %8 = vector.shape_cast %6 : vector<16x128xf32> to vector<1x2x8x128xf32>
    %cst = arith.constant dense<0.000000e+00> : vector<1x8x128xf32>
    %9 = vector.multi_reduction <add>, %8, %cst [1] : vector<1x2x8x128xf32> to vector<1x8x128xf32>
    %10 = arith.addf %7, %9 : vector<1x8x128xf32>
    %c0_7 = arith.constant 0 : index
    %c0_8 = arith.constant 0 : index
    %c0_9 = arith.constant 0 : index
    %11 = vector.load %arg4[%c0_7, %c0_8, %c0_9] : memref<1x8x128xf32, #tpu.memory_space<vmem>>, vector<1x8x128xf32>
    tpu.vector_store %arg4[%c0_7, %c0_8, %c0_9], %10 {strides = array<i32>} : memref<1x8x128xf32, #tpu.memory_space<vmem>>, vector<1x8x128xf32>,
    return
  }
  func.func @transform_0(%arg0: i32, %arg1: i32) -> (i32, i32) {
    %c1_i32 = arith.constant 1 : i32
    %0 = arith.muli %arg0, %c1_i32 : i32
    %1 = arith.addi %0, %arg1 : i32
    %c0_i32 = arith.constant 0 : i32
    %2 = arith.minsi %1, %c0_i32 : i32
    %c0_i32_0 = arith.constant 0 : i32
    %c0_i32_1 = arith.constant 0 : i32
    return %2, %c0_i32_0 : i32, i32
  }
  func.func @transform_1(%arg0: i32, %arg1: i32) -> (i32, i32) {
    %c1_i32 = arith.constant 1 : i32
    %0 = arith.muli %arg0, %c1_i32 : i32
    %1 = arith.addi %0, %arg1 : i32
    %c0_i32 = arith.constant 0 : i32
    %2 = arith.minsi %1, %c0_i32 : i32
    %c0_i32_0 = arith.constant 0 : i32
    %c0_i32_1 = arith.constant 0 : i32
    return %2, %c0_i32_0 : i32, i32
  }
  func.func @transform_2(%arg0: i32, %arg1: i32) -> (i32, i32, i32) {
    %c0_i32 = arith.constant 0 : i32
    %c0_i32_0 = arith.constant 0 : i32
    %c0_i32_1 = arith.constant 0 : i32
    return %arg0, %c0_i32, %c0_i32_0 : i32, i32, i32
  }
}

</mosaic_0001>

<bundles_post_ra>
// kernel: tpu_custom_call.1
= control target key start
LH: loop header
LB: loop body
LE: loop exit
PB: predicated region body
PF: predicated region fallthrough
CT: control target
= control target key end

     0   :  { %7 = vsyncpa [#allocation3], 0  ;;  %s231_s0 = inlined_call_operand.hbm [shape: f32[16,128], index: 0, kind: input, shape index: {}]   ;;  %s232_s1 = inlined_call_operand.hbm [shape: f32[16,128], index: 1, kind: input, shape index: {}]   ;;  %s233_s2 = inlined_call_operand.hbm [shape: f32[1,8,128], index: 2, kind: output, shape index: {}]  }
   0x1   :  { %8 = vsyncpa [#allocation6], 0 }
   0x2   :  { %9 = vsyncpa [#allocation4], 0  ;;  %s175_s9 = smov [#allocation2]   ;;  %s103_s13 = scalar_lea.hbm %s231_s0, 256 }
   0x3   :  { %s21_s10 = sshll.u32 %s175_s9, 4  ;;  %p104_p0 = scmp.ne.s32.totalorder %s231_s0, %s103_s13  ;;  %s22_s10 = int_to_ptr.vmem [resolvable:$true] %s21_s10 }
   0x4   :  { %p107_p1 = scmp.lt.u32.totalorder %s103_s13, %s231_s0 }
   0x6   :  { %p109_p2 = pnand %p107_p1, %p104_p0 }
   0x8   :  { %112 = shalt.err (!%p109_p2)
}
   0x9   :  { %s113_s18 = scalar_lea.vmem %s22_s10, 256  ;;  %p118_p4 = scmp.lt.s32.totalorder %s22_s10, %s22_s10 }
   0xa   :  { %p114_p3 = scmp.ne.s32.totalorder %s22_s10, %s113_s18  ;;  %p119_p5 = scmp.lt.s32.totalorder %s113_s18, %s113_s18 }
   0xc   :  { %p120_p6 = por %p119_p5, %p118_p4 }
   0xe   :  { %p121_p7 = pnand %p120_p6, %p114_p3 }
  0x10   :  { %124 = shalt.err (!%p121_p7)
}
  0x11   :  { %s176_s19 = smov 128   ;;  %s177_s20 = smov 8  }
  0x12   :  { %27 = dma.hbm_to_vmem [thread:$0]  %s231_s0, 256, %s22_s10, [#allocation3], %s176_s19, %s176_s19, %s177_s20  }
  0x13   :  { %s178_s23 = smov [#allocation5]   ;;  %s125_s27 = scalar_lea.hbm %s232_s1, 256 }
  0x14   :  { %s39_s24 = sshll.u32 %s178_s23, 4  ;;  %p126_p8 = scmp.ne.s32.totalorder %s232_s1, %s125_s27  ;;  %s40_s24 = int_to_ptr.vmem [resolvable:$true] %s39_s24 }
  0x15   :  { %p129_p9 = scmp.lt.u32.totalorder %s125_s27, %s232_s1 }
  0x17   :  { %p131_p10 = pnand %p129_p9, %p126_p8 }
  0x19   :  { %134 = shalt.err (!%p131_p10)
}
  0x1a   :  { %s135_s4 = scalar_lea.vmem %s40_s24, 256  ;;  %p140_p12 = scmp.lt.s32.totalorder %s40_s24, %s40_s24 }
  0x1b   :  { %p136_p11 = scmp.ne.s32.totalorder %s40_s24, %s135_s4  ;;  %p141_p13 = scmp.lt.s32.totalorder %s135_s4, %s135_s4 }
  0x1d   :  { %p142_p0 = por %p141_p13, %p140_p12 }
  0x1f   :  { %p143_p1 = pnand %p142_p0, %p136_p11 }
  0x21   :  { %146 = shalt.err (!%p143_p1)
}
  0x22   :  { %45 = dma.hbm_to_vmem [thread:$0]  %s232_s1, 256, %s40_s24, [#allocation6], %s176_s19, %s176_s19, %s177_s20  }
  0x23   :  { %169 = dma.done.wait [#allocation3], 256  }
  0x24   :  { %170 = vsyncadd [#allocation3], 4294967040 }
  0x25   :  { %171 = dma.done.wait [#allocation6], 256  }
  0x26   :  { %172 = vsyncadd [#allocation6], 4294967040  ;;  %v65_v0 = vld [vmem:[#allocation2] sm:$0xff]  ;;  %v66_v1 = vld [vmem:[#allocation2 + $0x8] sm:$0xff]  ;;  %s179_s6 = smov [#allocation7]  }
  0x27   :  { %v67_v2 = vld [vmem:[#allocation5] sm:$0xff]  ;;  %v68_v3 = vld [vmem:[#allocation5 + $0x8] sm:$0xff]  ;;  %s83_s7 = sshll.u32 %s179_s6, 4  ;;  %s84_s7 = int_to_ptr.vmem [resolvable:$true] %s83_s7 }
  0x28   :  { %v69_v4 = vsub.f32 %v65_v0, %v67_v2  ;;  %v70_v5 = vsub.f32 %v66_v1, %v68_v3  ;;  %s147_s8 = scalar_lea.vmem %s84_s7, 128  ;;  %p152_p3 = scmp.lt.s32.totalorder %s84_s7, %s84_s7 }
  0x29   :  { %p148_p2 = scmp.ne.s32.totalorder %s84_s7, %s147_s8  ;;  %p153_p4 = scmp.lt.s32.totalorder %s147_s8, %s147_s8 }
  0x2a   :  { %v71_v6 = vand.u32 2147483647, %v69_v4  ;;  %v72_v7 = vand.u32 2147483647, %v70_v5 }
  0x2b   :  { %p154_p5 = por %p153_p4, %p152_p3 }
  0x2c   :  { %v74_v8 = vadd.f32 %v72_v7, %v71_v6 }
  0x2d   :  { %p155_p6 = pnand %p154_p5, %p148_p2 }
  0x2e   :  { %76 = vst [vmem:[#allocation7] sm:$0xff] %v74_v8 }
  0x2f   :  { %158 = shalt.err (!%p155_p6)
}
  0x30   :  { %s159_s10 = scalar_lea.hbm %s233_s2, 128 }
  0x31   :  { %p160_p7 = scmp.ne.s32.totalorder %s233_s2, %s159_s10  ;;  %p163_p8 = scmp.lt.u32.totalorder %s159_s10, %s233_s2 }
  0x33   :  { %p165_p9 = pnand %p163_p8, %p160_p7 }
  0x35   :  { %168 = shalt.err (!%p165_p9)
}
  0x36   :  { %86 = dma.vmem_to_hbm [thread:$0]  %s84_s7, 128, %s233_s2, [#allocation4]  }
  0x37   :  { %173 = dma.done.wait [#allocation4], 128  }
  0x38   :  { %174 = vsyncadd [#allocation4], 4294967168 }
  0x39   :  { %90 = vsyncpa [#allocation3], 1 }
  0x3a   :  { %91 = vsyncpa [#allocation6], 1 }
  0x3b   :  { %92 = vsyncpa [#allocation4], 1 }

</bundles_post_ra>
